<compile_context>
chip_gen: v6e
topology: v6e:2x2x1
jax: 0.10.0
libtpu: 0.0.40
codegen_flags: <defaults>
</compile_context>

<pallas_src>
import jax
import jax.numpy as jnp
from jax.experimental import pallas as pl
from jax.experimental.pallas import tpu as pltpu

IN_DIM = 12        # true input features
OUT_DIM = 4        # true output features
OUT_PAD = 8        # padded output width written to HBM (>= OUT_DIM, f32-sublane friendly)
LANE = 128         # padded feature width used for lane-dense compute


def _round_up(x, m):
    return ((x + m - 1) // m) * m


def mlp_kernel(x_ref, w1_ref, b1_ref, w2_ref, b2_ref, w3_ref, b3_ref, o_ref):
    # Layer 1: (TB,12) @ (12,128) + (1,128) -> ReLU     (bf16 MXU, f32 acc)
    x = x_ref[...].astype(jnp.bfloat16)
    h1 = jnp.dot(x, w1_ref[...], preferred_element_type=jnp.float32)
    h1 = jnp.maximum(h1 + b1_ref[...], 0.0)
    # Layer 2: (TB,128) @ (128,128) + (1,128) -> ReLU
    h2 = jnp.dot(h1.astype(jnp.bfloat16), w2_ref[...],
                 preferred_element_type=jnp.float32)
    h2 = jnp.maximum(h2 + b2_ref[...], 0.0)
    # Layer 3: (TB,128) @ (128,128) + (1,128); only first OUT_PAD lanes are
    # written back to HBM (lanes >= OUT_DIM are exactly zero by construction).
    out = jnp.dot(h2.astype(jnp.bfloat16), w3_ref[...],
                  preferred_element_type=jnp.float32)
    out = out + b3_ref[...]
    o_ref[...] = out[:, :OUT_PAD].astype(o_ref.dtype)


def simple_net_forward(x, params, *, tile_b=2048):
    """x: (B, 12) float32 -> (B, 4) float32."""
    w1, b1, w2, b2, w3, b3 = params
    B = x.shape[0]

    # Batch tile: always a multiple of 8 (f32 sublane rule), capped at tile_b.
    TB = _round_up(min(tile_b, B), 8)
    B_pad = _round_up(B, TB)
    if B_pad != B:
        x = jnp.pad(x, ((0, B_pad - B), (0, 0)))
    grid = (B_pad // TB,)

    out = pl.pallas_call(
        mlp_kernel,
        out_shape=jax.ShapeDtypeStruct((B_pad, OUT_PAD), jnp.float32),
        grid=grid,
        in_specs=[
            # x: streamed per batch tile
            pl.BlockSpec((TB, IN_DIM), lambda i: (i, 0)),
            # weights / biases: constant index_map -> resident across steps
            pl.BlockSpec((IN_DIM, LANE), lambda i: (0, 0)),
            pl.BlockSpec((1, LANE), lambda i: (0, 0)),
            pl.BlockSpec((LANE, LANE), lambda i: (0, 0)),
            pl.BlockSpec((1, LANE), lambda i: (0, 0)),
            pl.BlockSpec((LANE, LANE), lambda i: (0, 0)),
            pl.BlockSpec((1, LANE), lambda i: (0, 0)),
        ],
        out_specs=pl.BlockSpec((TB, OUT_PAD), lambda i: (i, 0)),
        compiler_params=pltpu.CompilerParams(
            dimension_semantics=("parallel",)),
    )(x, w1, b1, w2, b2, w3, b3)

    return out[:B, :OUT_DIM]


def init_params(key):
    """nn.Linear-style U(-1/sqrt(fan_in), 1/sqrt(fan_in)) init, zero-padded
    to 128 lanes. Weights stored transposed (in, out) and cast to bf16;
    biases stay f32. Padded entries are exactly zero."""
    def linear(key, fan_in, fan_out, k_pad, n_pad):
        kw, kb = jax.random.split(key)
        bound = 1.0 / jnp.sqrt(fan_in)
        w = jax.random.uniform(kw, (fan_in, fan_out), jnp.float32, -bound, bound)
        b = jax.random.uniform(kb, (1, fan_out), jnp.float32, -bound, bound)
        w = jnp.pad(w, ((0, k_pad - fan_in), (0, n_pad - fan_out)))
        b = jnp.pad(b, ((0, 0), (0, n_pad - fan_out)))
        return w.astype(jnp.bfloat16), b

    k1, k2, k3 = jax.random.split(key, 3)
    w1, b1 = linear(k1, 12, 64, IN_DIM, LANE)
    w2, b2 = linear(k2, 64, 32, LANE, LANE)
    w3, b3 = linear(k3, 32, 4, LANE, LANE)
    return (w1, b1, w2, b2, w3, b3)


if __name__ == "__main__":
    key = jax.random.PRNGKey(0)
    kp, kx = jax.random.split(key)
    params = init_params(kp)

    B = 8
    x = jax.random.normal(kx, (B, IN_DIM), jnp.float32)

    out = simple_net_forward(x, params)
    out = jax.block_until_ready(out)
    assert out.shape == (B, OUT_DIM)

    # Reference in plain JAX, emulating the kernel's bf16 operand rounding
    # (f32 accumulation), on the same zero-padded weights.
    w1, b1, w2, b2, w3, b3 = params

    def bf16_round(a):
        return a.astype(jnp.bfloat16).astype(jnp.float32)

    h = jnp.maximum(bf16_round(x) @ w1.astype(jnp.float32) + b1, 0.0)
    h = jnp.maximum(bf16_round(h) @ w2.astype(jnp.float32) + b2, 0.0)
    ref = (bf16_round(h) @ w3.astype(jnp.float32) + b3)[:, :OUT_DIM]

    assert jnp.allclose(out, ref, atol=2e-4, rtol=2e-4), (
        f"max abs err {jnp.max(jnp.abs(out - ref))}")

    print("KERNEL_OK")
</pallas_src>

<mosaic_0001>
module attributes {stable_mosaic.version = 11 : i64} {
  func.func @mlp_kernel(%arg0: i32, %arg1: memref<8x12xf32, #tpu.memory_space<vmem>>, %arg2: memref<12x128xbf16, #tpu.memory_space<vmem>>, %arg3: memref<1x128xf32, #tpu.memory_space<vmem>>, %arg4: memref<128x128xbf16, #tpu.memory_space<vmem>>, %arg5: memref<1x128xf32, #tpu.memory_space<vmem>>, %arg6: memref<128x128xbf16, #tpu.memory_space<vmem>>, %arg7: memref<1x128xf32, #tpu.memory_space<vmem>>, %arg8: memref<8x8xf32, #tpu.memory_space<vmem>>) attributes {dimension_semantics = [#tpu.dimension_semantics<parallel>], iteration_bounds = array<i64: 1>, scalar_prefetch = 0 : i64, scratch_operands = 0 : i64, tpu.core_type = #tpu.core_type<tc>, window_params = [{transform_indices = @transform_0, window_bounds = array<i64: 8, 12>}, {pipeline_mode = #tpu.pipeline_mode<synchronous>, transform_indices = @transform_1, window_bounds = array<i64: 12, 128>}, {pipeline_mode = #tpu.pipeline_mode<synchronous>, transform_indices = @transform_2, window_bounds = array<i64: 1, 128>}, {pipeline_mode = #tpu.pipeline_mode<synchronous>, transform_indices = @transform_3, window_bounds = array<i64: 128, 128>}, {pipeline_mode = #tpu.pipeline_mode<synchronous>, transform_indices = @transform_4, window_bounds = array<i64: 1, 128>}, {pipeline_mode = #tpu.pipeline_mode<synchronous>, transform_indices = @transform_5, window_bounds = array<i64: 128, 128>}, {pipeline_mode = #tpu.pipeline_mode<synchronous>, transform_indices = @transform_6, window_bounds = array<i64: 1, 128>}, {transform_indices = @transform_7, window_bounds = array<i64: 8, 8>}]} {
    %c0 = arith.constant 0 : index
    %c0_0 = arith.constant 0 : index
    %0 = vector.load %arg1[%c0, %c0_0] : memref<8x12xf32, #tpu.memory_space<vmem>>, vector<8x12xf32>
    %1 = arith.truncf %0 : vector<8x12xf32> to vector<8x12xbf16>
    %c0_1 = arith.constant 0 : index
    %c0_2 = arith.constant 0 : index
    %2 = vector.load %arg2[%c0_1, %c0_2] : memref<12x128xbf16, #tpu.memory_space<vmem>>, vector<12x128xbf16>
    %cst = arith.constant dense<0.000000e+00> : vector<8x128xf32>
    %3 = tpu.matmul %1, %2, %cst {dimension_numbers = #tpu.dot_dimension_numbers<[1], [0], [0], [1], [0, 0, 1, 1], [], []>} : vector<8x12xbf16>, vector<12x128xbf16>, vector<8x128xf32> -> vector<8x128xf32>
    %c0_3 = arith.constant 0 : index
    %c0_4 = arith.constant 0 : index
    %4 = vector.load %arg3[%c0_3, %c0_4] : memref<1x128xf32, #tpu.memory_space<vmem>>, vector<1x128xf32>
    %5 = vector.broadcast %4 : vector<1x128xf32> to vector<8x128xf32>
    %6 = arith.addf %3, %5 : vector<8x128xf32>
    %cst_5 = arith.constant 0.000000e+00 : f32
    %7 = vector.broadcast %cst_5 : f32 to vector<8x128xf32>
    %8 = arith.maximumf %6, %7 : vector<8x128xf32>
    %9 = arith.truncf %8 : vector<8x128xf32> to vector<8x128xbf16>
    %c0_6 = arith.constant 0 : index
    %c0_7 = arith.constant 0 : index
    %10 = vector.load %arg4[%c0_6, %c0_7] : memref<128x128xbf16, #tpu.memory_space<vmem>>, vector<128x128xbf16>
    %cst_8 = arith.constant dense<0.000000e+00> : vector<8x128xf32>
    %11 = tpu.matmul %9, %10, %cst_8 {dimension_numbers = #tpu.dot_dimension_numbers<[1], [0], [0], [1], [0, 0, 1, 1], [], []>} : vector<8x128xbf16>, vector<128x128xbf16>, vector<8x128xf32> -> vector<8x128xf32>
    %c0_9 = arith.constant 0 : index
    %c0_10 = arith.constant 0 : index
    %12 = vector.load %arg5[%c0_9, %c0_10] : memref<1x128xf32, #tpu.memory_space<vmem>>, vector<1x128xf32>
    %13 = vector.broadcast %12 : vector<1x128xf32> to vector<8x128xf32>
    %14 = arith.addf %11, %13 : vector<8x128xf32>
    %cst_11 = arith.constant 0.000000e+00 : f32
    %15 = vector.broadcast %cst_11 : f32 to vector<8x128xf32>
    %16 = arith.maximumf %14, %15 : vector<8x128xf32>
    %17 = arith.truncf %16 : vector<8x128xf32> to vector<8x128xbf16>
    %c0_12 = arith.constant 0 : index
    %c0_13 = arith.constant 0 : index
    %18 = vector.load %arg6[%c0_12, %c0_13] : memref<128x128xbf16, #tpu.memory_space<vmem>>, vector<128x128xbf16>
    %cst_14 = arith.constant dense<0.000000e+00> : vector<8x128xf32>
    %19 = tpu.matmul %17, %18, %cst_14 {dimension_numbers = #tpu.dot_dimension_numbers<[1], [0], [0], [1], [0, 0, 1, 1], [], []>} : vector<8x128xbf16>, vector<128x128xbf16>, vector<8x128xf32> -> vector<8x128xf32>
    %c0_15 = arith.constant 0 : index
    %c0_16 = arith.constant 0 : index
    %20 = vector.load %arg7[%c0_15, %c0_16] : memref<1x128xf32, #tpu.memory_space<vmem>>, vector<1x128xf32>
    %21 = vector.broadcast %20 : vector<1x128xf32> to vector<8x128xf32>
    %22 = arith.addf %19, %21 : vector<8x128xf32>
    %23 = vector.extract_strided_slice %22 {offsets = [0, 0], sizes = [8, 8], strides = [1, 1]} : vector<8x128xf32> to vector<8x8xf32>
    %c0_17 = arith.constant 0 : index
    %c0_18 = arith.constant 0 : index
    %24 = vector.load %arg8[%c0_17, %c0_18] : memref<8x8xf32, #tpu.memory_space<vmem>>, vector<8x8xf32>
    tpu.vector_store %arg8[%c0_17, %c0_18], %23 {strides = array<i32>} : memref<8x8xf32, #tpu.memory_space<vmem>>, vector<8x8xf32>,
    return
  }
  func.func @transform_0(%arg0: i32) -> (i32, i32) {
    %c0_i32 = arith.constant 0 : i32
    %c0_i32_0 = arith.constant 0 : i32
    return %arg0, %c0_i32 : i32, i32
  }
  func.func @transform_1(%arg0: i32) -> (i32, i32) {
    %c0_i32 = arith.constant 0 : i32
    %c0_i32_0 = arith.constant 0 : i32
    %c0_i32_1 = arith.constant 0 : i32
    return %c0_i32, %c0_i32_0 : i32, i32
  }
  func.func @transform_2(%arg0: i32) -> (i32, i32) {
    %c0_i32 = arith.constant 0 : i32
    %c0_i32_0 = arith.constant 0 : i32
    %c0_i32_1 = arith.constant 0 : i32
    return %c0_i32, %c0_i32_0 : i32, i32
  }
  func.func @transform_3(%arg0: i32) -> (i32, i32) {
    %c0_i32 = arith.constant 0 : i32
    %c0_i32_0 = arith.constant 0 : i32
    %c0_i32_1 = arith.constant 0 : i32
    return %c0_i32, %c0_i32_0 : i32, i32
  }
  func.func @transform_4(%arg0: i32) -> (i32, i32) {
    %c0_i32 = arith.constant 0 : i32
    %c0_i32_0 = arith.constant 0 : i32
    %c0_i32_1 = arith.constant 0 : i32
    return %c0_i32, %c0_i32_0 : i32, i32
  }
  func.func @transform_5(%arg0: i32) -> (i32, i32) {
    %c0_i32 = arith.constant 0 : i32
    %c0_i32_0 = arith.constant 0 : i32
    %c0_i32_1 = arith.constant 0 : i32
    return %c0_i32, %c0_i32_0 : i32, i32
  }
  func.func @transform_6(%arg0: i32) -> (i32, i32) {
    %c0_i32 = arith.constant 0 : i32
    %c0_i32_0 = arith.constant 0 : i32
    %c0_i32_1 = arith.constant 0 : i32
    return %c0_i32, %c0_i32_0 : i32, i32
  }
  func.func @transform_7(%arg0: i32) -> (i32, i32) {
    %c0_i32 = arith.constant 0 : i32
    %c0_i32_0 = arith.constant 0 : i32
    return %arg0, %c0_i32 : i32, i32
  }
}

</mosaic_0001>

<bundles_post_ra>
// kernel: tpu_custom_call.1
= control target key start
LH: loop header
LB: loop body
LE: loop exit
PB: predicated region body
PF: predicated region fallthrough
CT: control target
= control target key end

     0   :  { %12 = vsyncpa [#allocation3], 0  ;;  %s716_s0 = inlined_call_operand.hbm [shape: f32[8,12], index: 0, kind: input, shape index: {}]   ;;  %s717_s1 = inlined_call_operand.hbm [shape: bf16[12,128], index: 1, kind: input, shape index: {}]   ;;  %s718_s2 = inlined_call_operand.vmem [shape: f32[1,128], index: 2, kind: input, shape index: {}]   ;;  %s719_s3 = inlined_call_operand.hbm [shape: bf16[128,128], index: 3, kind: input, shape index: {}]   ;;  %s720_s4 = inlined_call_operand.vmem [shape: f32[1,128], index: 4, kind: input, shape index: {}]   ;;  %s721_s5 = inlined_call_operand.hbm [shape: bf16[128,128], index: 5, kind: input, shape index: {}]   ;;  %s722_s6 = inlined_call_operand.vmem [shape: f32[1,128], index: 6, kind: input, shape index: {}]   ;;  %s723_s7 = inlined_call_operand.hbm [shape: f32[8,8], index: 7, kind: output, shape index: {}]  }
   0x1   :  { %13 = vsyncpa [#allocation6], 0 }
   0x2   :  { %14 = vsyncpa [#allocation9], 0 }
   0x3   :  { %15 = vsyncpa [#allocation4], 0  ;;  %s611_s24 = smov [#allocation5]  }
   0x4   :  { %s31_s25 = sshll.u32 %s611_s24, 4  ;;  %s32_s25 = int_to_ptr.vmem [resolvable:$true] %s31_s25 }
   0x5   :  { %s511_s26 = scalar_lea.vmem %s32_s25, 128  ;;  %p516_p1 = scmp.lt.s32.totalorder %s32_s25, %s32_s25 }
   0x6   :  { %p512_p0 = scmp.ne.s32.totalorder %s32_s25, %s511_s26  ;;  %p517_p2 = scmp.lt.s32.totalorder %s511_s26, %s511_s26 }
   0x8   :  { %p518_p3 = por %p517_p2, %p516_p1 }
   0xa   :  { %p519_p4 = pnand %p518_p3, %p512_p0 }
   0xc   :  { %522 = shalt.err (!%p519_p4)
}
   0xd   :  { %s612_s27 = smov 64   ;;  %s613_s28 = smov 4  }
   0xe   :  { %37 = dma.hbm_to_vmem [thread:$0]  %s717_s1, 128, %s32_s25, [#allocation6], %s612_s27, %s612_s27, %s613_s28  }
   0xf   :  { %s614_s8 = smov [#allocation2]   ;;  %s615_s10 = smov [#allocation7]  }
  0x10   :  { %s22_s9 = sshll.u32 %s614_s8, 4  ;;  %s45_s11 = sshll.u32 %s615_s10, 4  ;;  %s23_s9 = int_to_ptr.vmem [resolvable:$true] %s22_s9  ;;  %s46_s11 = int_to_ptr.vmem [resolvable:$true] %s45_s11 }
  0x11   :  { %s531_s12 = scalar_lea.vmem %s23_s9, 128  ;;  %p536_p6 = scmp.lt.s32.totalorder %s23_s9, %s23_s9 }
  0x12   :  { %p532_p5 = scmp.ne.s32.totalorder %s23_s9, %s531_s12  ;;  %p537_p7 = scmp.lt.s32.totalorder %s531_s12, %s531_s12 }
  0x14   :  { %p538_p8 = por %p537_p7, %p536_p6 }
  0x16   :  { %p539_p9 = pnand %p538_p8, %p532_p5 }
  0x18   :  { %542 = shalt.err (!%p539_p9)
}
  0x19   :  { %25 = dma.hbm_to_vmem [thread:$0]  %s716_s0, 128, %s23_s9, [#allocation3]  }
  0x1a   :  { %s551_s15 = scalar_lea.vmem %s46_s11, 1024  ;;  %p556_p11 = scmp.lt.s32.totalorder %s46_s11, %s46_s11 }
  0x1b   :  { %p552_p10 = scmp.ne.s32.totalorder %s46_s11, %s551_s15  ;;  %p557_p12 = scmp.lt.s32.totalorder %s551_s15, %s551_s15 }
  0x1d   :  { %p558_p13 = por %p557_p12, %p556_p11 }
  0x1f   :  { %p559_p0 = pnand %p558_p13, %p552_p10 }
  0x21   :  { %562 = shalt.err (!%p559_p0)
}
  0x22   :  { %51 = dma.hbm_to_vmem [thread:$0]  %s719_s3, 1024, %s46_s11, [#allocation6], %s612_s27, %s612_s27, %s613_s28  }
  0x23   :  { %s616_s17 = smov [#allocation8]  }
  0x24   :  { %s59_s18 = sshll.u32 %s616_s17, 4  ;;  %s60_s18 = int_to_ptr.vmem [resolvable:$true] %s59_s18 }
  0x25   :  { %s571_s19 = scalar_lea.vmem %s60_s18, 1024  ;;  %p576_p2 = scmp.lt.s32.totalorder %s60_s18, %s60_s18 }
  0x26   :  { %p572_p1 = scmp.ne.s32.totalorder %s60_s18, %s571_s19  ;;  %p577_p3 = scmp.lt.s32.totalorder %s571_s19, %s571_s19 }
  0x28   :  { %p578_p4 = por %p577_p3, %p576_p2 }
  0x2a   :  { %p579_p5 = pnand %p578_p4, %p572_p1 }
  0x2c   :  { %582 = shalt.err (!%p579_p5)
}
  0x2d   :  { %65 = dma.hbm_to_vmem [thread:$0]  %s721_s5, 1024, %s60_s18, [#allocation9], %s612_s27, %s612_s27, %s613_s28  }
  0x2e   :  { %603 = dma.done.wait [#allocation3], 128  }
  0x2f   :  { %604 = vsyncadd [#allocation3], 4294967168 }
  0x30   :  { %605 = dma.done.wait [#allocation6], 1152  }
  0x31   :  { %606 = vsyncadd [#allocation6], 4294966144 }
  0x32   :  { %607 = dma.done.wait [#allocation9], 1024  }
  0x33   :  { %608 = vsyncadd [#allocation9], 4294966272  ;;  %v617_v0 = vmov 0.0   ;;  %vm618_vm0 = vmmov 0   ;;  %vm101_vm1 = vcmask 1045504   ;;  %v81_v2 = vld [vmem:[#allocation2] sm:$0xff] }
  0x34   :  { %431 = vmatprep.subr.bf16.mxu0 %v617_v0  ;;  %433 = vmatprep.mubr.msk.bf16.mxu0 %vm618_vm0, %v617_v0  ;;  %v486_v1 = vld [vmem:[#allocation5] sm:$0x3f]   ;;  %v82_v4 = vpack.c.bf16 %v81_v2, %v81_v2  ;;  %vm97_vm2 = vcmask 97280   ;;  %v488_v6 = vld [vmem:[#allocation7 + $0x30] sm:$0xff]   ;;  %v489_v7 = vld [vmem:[#allocation7 + $0x28] sm:$0xff]   ;;  %s619_s24 = smov [#allocation10]  }
  0x35   :  { %437 = vmatprep.subr.bf16.mxu1 %v617_v0  ;;  %453 = vmatprep.mubr.msk.bf16.mxu1 %vm618_vm0, %v617_v0  ;;  %v103_v3 = vsel %vm101_vm1, %v486_v1, 0  ;;  %v487_v5 = vld [vmem:[#allocation7 + $0x38] sm:$0xff]   ;;  %v490_v8 = vld [vmem:[#allocation7 + $0x20] sm:$0xff]   ;;  %v492_v10 = vld [vmem:[#allocation7 + $0x10] sm:$0xff]   ;;  %s379_s25 = sshll.u32 %s619_s24, 4  ;;  %vm371_vm3 = vcmask 64512   ;;  %s380_s25 = int_to_ptr.vmem [resolvable:$true] %s379_s25 }
  0x36   :  { %432 = vmatpush3.bf16.msra.mxu0 %v103_v3  ;;  %438 = vmatpush3.bf16.msra.mxu1 %v487_v5  ;;  %v491_v9 = vld [vmem:[#allocation7 + $0x18] sm:$0xff]   ;;  %v493_v11 = vld [vmem:[#allocation7 + $0x8] sm:$0xff]   ;;  %v494_v12 = vld [vmem:[#allocation7] sm:$0xff]   ;;  %p588_p7 = scmp.lt.s32.totalorder %s380_s25, %s380_s25 }
  0x37   :  { %457 = vmatprep.subr.bf16.mxu0 %v617_v0  ;;  %439 = vmatprep.subr.bf16.mxu1 %v617_v0  ;;  %v495_v13 = vld [vmem:[#allocation8 + $0x38] sm:$0xff]   ;;  %v496_v14 = vld [vmem:[#allocation8 + $0x30] sm:$0xff]   ;;  %v497_v15 = vld [vmem:[#allocation8 + $0x28] sm:$0xff]  }
  0x38   :  { %v498_v16 = vld [vmem:[#allocation8 + $0x20] sm:$0xff]   ;;  %v499_v17 = vld [vmem:[#allocation8 + $0x18] sm:$0xff]   ;;  %v500_v18 = vld [vmem:[#allocation8 + $0x10] sm:$0xff]  }
  0x39   :  { %434 = vmatmul.mubr.msk.bf16.vlgmr.msra.gmra.mxu0 %vm97_vm2, %v82_v4  ;;  %v390_v19 = vld [vmem:[%s718_s2] ss:$0 sm:$0xff]  ;;  %v501_v27 = vld [vmem:[#allocation8 + $0x8] sm:$0xff]   ;;  %v502_v28 = vld [vmem:[#allocation8] sm:$0xff]  }
  0x3a   :  { %473 = vmatprep.mubr.msk.bf16.mxu0 %vm618_vm0, %v617_v0  ;;  %440 = vmatpush3.bf16.msra.mxu1 %v488_v6  ;;  %v393_v29 = vld [vmem:[%s720_s4] ss:$0 sm:$0xff]  ;;  %s583_s4 = scalar_lea.vmem %s380_s25, 128 }
  0x3b   :  { %441 = vmatprep.subr.bf16.mxu1 %v617_v0  ;;  %458 = vmatpush3.bf16.msra.mxu0 %v495_v13  ;;  %v402_v37 = vld [vmem:[%s722_s6] ss:$0 sm:$0xff]  ;;  %p584_p6 = scmp.ne.s32.totalorder %s380_s25, %s583_s4  ;;  %p589_p8 = scmp.lt.s32.totalorder %s583_s4, %s583_s4 }
  0x3c   :  { %459 = vmatprep.subr.bf16.mxu0 %v617_v0 }
  0x3d   :  { %p590_p9 = por %p589_p8, %p588_p7 }
  0x3e   :  { %442 = vmatpush3.bf16.msra.mxu1 %v489_v7 }
  0x3f   :  { %443 = vmatprep.subr.bf16.mxu1 %v617_v0  ;;  %460 = vmatpush3.bf16.msra.mxu0 %v496_v14  ;;  %p591_p10 = pnand %p590_p9, %p584_p6 }
  0x40   :  { %461 = vmatprep.subr.bf16.mxu0 %v617_v0 }
  0x42   :  { %444 = vmatpush3.bf16.msra.mxu1 %v490_v8 }
  0x43   :  { %445 = vmatprep.subr.bf16.mxu1 %v617_v0  ;;  %462 = vmatpush3.bf16.msra.mxu0 %v497_v15 }
  0x44   :  { %463 = vmatprep.subr.bf16.mxu0 %v617_v0 }
  0x46   :  { %446 = vmatpush3.bf16.msra.mxu1 %v491_v9 }
  0x47   :  { %447 = vmatprep.subr.bf16.mxu1 %v617_v0  ;;  %464 = vmatpush3.bf16.msra.mxu0 %v498_v16 }
  0x48   :  { %465 = vmatprep.subr.bf16.mxu0 %v617_v0 }
  0x4a   :  { %448 = vmatpush3.bf16.msra.mxu1 %v492_v10 }
  0x4b   :  { %449 = vmatprep.subr.bf16.mxu1 %v617_v0  ;;  %466 = vmatpush3.bf16.msra.mxu0 %v499_v17 }
  0x4c   :  { %467 = vmatprep.subr.bf16.mxu0 %v617_v0 }
  0x4e   :  { %450 = vmatpush3.bf16.msra.mxu1 %v493_v11 }
  0x4f   :  { %451 = vmatprep.subr.bf16.mxu1 %v617_v0  ;;  %468 = vmatpush3.bf16.msra.mxu0 %v500_v18 }
  0x50   :  { %469 = vmatprep.subr.bf16.mxu0 %v617_v0 }
  0x52   :  { %452 = vmatpush3.bf16.msra.mxu1 %v494_v12 }
  0x53   :  { %470 = vmatpush3.bf16.msra.mxu0 %v501_v27 }
  0x54   :  { %471 = vmatprep.subr.bf16.mxu0 %v617_v0 }
  0x57   :  { %472 = vmatpush3.bf16.msra.mxu0 %v502_v28 }
  0xf9   :  { %v139_v20 = vpop.f32.mrf.mxu0 }
  0xfa   :  { %v140_v21 = vadd.f32 %v390_v19, %v139_v20 }
  0xfb   :  { %v435_v22 = vpop.f32.mrf.mxu0 }
  0xfc   :  { %v145_v23 = vmax.f32 %v140_v21, 0.0 }
  0xfd   :  { %v142_v24 = vpop.f32.mrf.mxu0 }
  0xfe   :  { %v146_v25 = vpack.c.bf16 %v145_v23, %v145_v23 }
  0xff   :  { %v436_v26 = vpop.f32.mrf.mxu0 }
 0x100   :  { %454 = vmatmul.mubr.bf16.vlgmr.msra.gmra.mxu1 %v146_v25 }
 0x1c0   :  { %v252_v30 = vpop.f32.mrf.mxu1 }
 0x1c1   :  { %v253_v31 = vadd.f32 %v393_v29, %v252_v30 }
 0x1c2   :  { %v455_v32 = vpop.f32.mrf.mxu1 }
 0x1c3   :  { %v258_v33 = vmax.f32 %v253_v31, 0.0 }
 0x1c4   :  { %v255_v34 = vpop.f32.mrf.mxu1 }
 0x1c5   :  { %v259_v35 = vpack.c.bf16 %v258_v33, %v258_v33 }
 0x1c6   :  { %v456_v36 = vpop.f32.mrf.mxu1 }
 0x1c7   :  { %474 = vmatmul.mubr.bf16.vlgmr.msra.gmra.mxu0 %v259_v35 }
 0x287   :  { %v365_v38 = vpop.f32.mrf.mxu0 }
 0x288   :  { %v366_v39 = vadd.f32 %v402_v37, %v365_v38 }
 0x289   :  { %v475_v40 = vpop.f32.mrf.mxu0 }
 0x28a   :  { %372 = vst.msk [vmem:[#allocation10] sm:$0xff] %vm371_vm3, %v366_v39 }
 0x28b   :  { %v368_v41 = vpop.f32.mrf.mxu0 }
 0x28c   :  { %594 = shalt.err (!%p591_p10)
}
 0x28d   :  { %382 = dma.vmem_to_hbm [thread:$0]  %s380_s25, 128, %s723_s7, [#allocation4]   ;;  %v476_v42 = vpop.f32.mrf.mxu0 }
 0x28e   :  { %609 = dma.done.wait [#allocation4], 128  }
 0x28f   :  { %610 = vsyncadd [#allocation4], 4294967168 }
 0x290   :  { %386 = vsyncpa [#allocation3], 1 }
 0x291   :  { %387 = vsyncpa [#allocation6], 1 }
 0x292   :  { %388 = vsyncpa [#allocation9], 1 }
 0x293   :  { %389 = vsyncpa [#allocation4], 1 }

</bundles_post_ra>
